<compile_context>
chip_gen: v7x
topology: tpu7x:2x2x1
jax: 0.10.0
libtpu: 0.0.40
codegen_flags: <defaults>
</compile_context>

<pallas_src>
import functools

import jax
import jax.numpy as jnp
from jax import lax
from jax.experimental import pallas as pl
from jax.experimental.pallas import tpu as pltpu

LANES = 128
MAX_BLOCK_ROWS = 1024  # (1024, 128) f32 tile = 512 KiB per input per buffer


def _cdiv(a, b):
    return (a + b - 1) // b


def _dice_partial_kernel(p_ref, t_ref, o_ref, acc_i, acc_p, acc_t, *,
                         square, steps, block_rows, valid_rows, mask_needed):
    c = pl.program_id(0)
    j = pl.program_id(1)

    @pl.when(j == 0)
    def _():
        acc_i[...] = jnp.zeros_like(acc_i)
        acc_p[...] = jnp.zeros_like(acc_p)
        acc_t[...] = jnp.zeros_like(acc_t)

    p = p_ref[...].astype(jnp.float32)
    t = t_ref[...].astype(jnp.float32)

    inter = p * t
    psum = p * p if square else p
    tsum = t * t if square else t

    if mask_needed:
        # Global row index of each element; rows >= valid_rows are padding
        # (partial last block or a fully-clamped redundant block) -> zero them.
        row0 = (c * steps + j) * block_rows
        row_idx = lax.broadcasted_iota(jnp.int32, p.shape, 0) + row0
        valid = row_idx < valid_rows
        zero = jnp.zeros_like(inter)
        inter = jnp.where(valid, inter, zero)
        psum = jnp.where(valid, psum, zero)
        tsum = jnp.where(valid, tsum, zero)

    # Sublane reduce per tile; keep lanes separate until the very end.
    acc_i[...] += jnp.sum(inter, axis=0, keepdims=True)
    acc_p[...] += jnp.sum(psum, axis=0, keepdims=True)
    acc_t[...] += jnp.sum(tsum, axis=0, keepdims=True)

    @pl.when(j == steps - 1)
    def _():
        # One cross-lane reduction per quantity per core, at the end only.
        o_ref[0, 0] = jnp.sum(acc_i[...])
        o_ref[0, 1] = jnp.sum(acc_p[...])
        o_ref[0, 2] = jnp.sum(acc_t[...])


def dice_loss(predictions, targets, *, smooth=1.0, square=True):
    """Pallas TPU implementation of DiceLoss.forward.

    predictions, targets: arrays of any (matching) shape — flattened like the
    PyTorch `view(-1)`.  Inputs stream in their native dtype (f32/bf16) and
    are accumulated in float32.  Returns a scalar float32 dice loss.
    """
    p_flat = jnp.reshape(predictions, (-1,))
    t_flat = jnp.reshape(targets, (-1,))
    n = p_flat.shape[0]

    main = (n // LANES) * LANES
    rows = main // LANES

    # Ragged tail (< 128 elements): negligible, handled with plain jnp so the
    # kernel never needs a full-array pad/copy.
    if main < n:
        p_tail = p_flat[main:].astype(jnp.float32)
        t_tail = t_flat[main:].astype(jnp.float32)
        tail_i = jnp.sum(p_tail * t_tail)
        tail_p = jnp.sum(p_tail * p_tail) if square else jnp.sum(p_tail)
        tail_t = jnp.sum(t_tail * t_tail) if square else jnp.sum(t_tail)
    else:
        tail_i = tail_p = tail_t = jnp.float32(0.0)

    if rows == 0:
        inter, psum, tsum = tail_i, tail_p, tail_t
    else:
        p2d = (p_flat if main == n else p_flat[:main]).reshape(rows, LANES)
        t2d = (t_flat if main == n else t_flat[:main]).reshape(rows, LANES)

        # Large tiles; if the whole array is smaller than one tile, a single
        # full-extent block is used (always BlockSpec-legal).
        block_rows = rows if rows < MAX_BLOCK_ROWS else MAX_BLOCK_ROWS
        nblocks = _cdiv(rows, block_rows)
        ncores = 2 if nblocks >= 2 else 1  # v7x megacore split; free elsewhere
        steps = _cdiv(nblocks, ncores)
        mask_needed = (ncores * steps * block_rows != rows)

        def in_map(c, j):
            # Clamp so a step past the last real block just re-reads it; its
            # contribution is masked to zero inside the kernel.
            return (jnp.minimum(c * steps + j, nblocks - 1), 0)

        kernel = functools.partial(
            _dice_partial_kernel,
            square=bool(square),
            steps=int(steps),
            block_rows=int(block_rows),
            valid_rows=int(rows),
            mask_needed=bool(mask_needed),
        )

        partials = pl.pallas_call(
            kernel,
            out_shape=jax.ShapeDtypeStruct((ncores, 3), jnp.float32),
            grid_spec=pltpu.PrefetchScalarGridSpec(
                num_scalar_prefetch=0,
                grid=(ncores, steps),
                in_specs=[
                    pl.BlockSpec((block_rows, LANES), in_map),
                    pl.BlockSpec((block_rows, LANES), in_map),
                ],
                out_specs=pl.BlockSpec((1, 3), lambda c, j: (c, 0),
                                       memory_space=pltpu.SMEM),
                scratch_shapes=[pltpu.VMEM((1, LANES), jnp.float32)] * 3,
            ),
            compiler_params=pltpu.CompilerParams(
                dimension_semantics=("parallel", "arbitrary")),
        )(p2d, t2d)

        inter = jnp.sum(partials[:, 0]) + tail_i
        psum = jnp.sum(partials[:, 1]) + tail_p
        tsum = jnp.sum(partials[:, 2]) + tail_t

    smooth = jnp.float32(smooth)
    dice = (2.0 * inter + smooth) / (psum + tsum + smooth)
    return jnp.float32(1.0) - dice


def _dice_loss_ref(predictions, targets, smooth=1.0, square=True):
    p = jnp.reshape(predictions, (-1,)).astype(jnp.float32)
    t = jnp.reshape(targets, (-1,)).astype(jnp.float32)
    inter = jnp.sum(p * t)
    if square:
        ps, ts = jnp.sum(p * p), jnp.sum(t * t)
    else:
        ps, ts = jnp.sum(p), jnp.sum(t)
    dice = (2.0 * inter + smooth) / (ps + ts + smooth)
    return 1.0 - dice


if __name__ == "__main__":
    key = jax.random.PRNGKey(0)
    k1, k2, k3, k4 = jax.random.split(key, 4)

    # Small, lane-aligned case: predictions are probabilities, targets in [0,1].
    preds = jax.nn.sigmoid(jax.random.normal(k1, (2, 1, 64, 64), jnp.float32))
    targs = jax.random.uniform(k2, (2, 1, 64, 64), jnp.float32)

    loss = jax.block_until_ready(dice_loss(preds, targs, smooth=1.0, square=True))
    ref = _dice_loss_ref(preds, targs, smooth=1.0, square=True)
    assert jnp.allclose(loss, ref, atol=1e-5, rtol=1e-5), (loss, ref)

    # Non-square variant.
    loss_ns = jax.block_until_ready(dice_loss(preds, targs, smooth=1.0, square=False))
    ref_ns = _dice_loss_ref(preds, targs, smooth=1.0, square=False)
    assert jnp.allclose(loss_ns, ref_ns, atol=1e-5, rtol=1e-5), (loss_ns, ref_ns)

    # bf16 inputs stay bf16 in HBM; the kernel upcasts in-register.
    preds_bf = preds.astype(jnp.bfloat16)
    targs_bf = targs.astype(jnp.bfloat16)
    loss_bf = jax.block_until_ready(dice_loss(preds_bf, targs_bf))
    ref_bf = _dice_loss_ref(preds_bf, targs_bf)
    assert jnp.allclose(loss_bf, ref_bf, atol=1e-4, rtol=1e-4), (loss_bf, ref_bf)

    # Ragged case: multi-block grid, 2-way core split, masked partial/clamped
    # blocks, and a <128-element jnp tail.
    preds_r = jax.nn.sigmoid(jax.random.normal(k3, (5, 1, 253, 253), jnp.float32))
    targs_r = jax.random.uniform(k4, (5, 1, 253, 253), jnp.float32)
    loss_r = jax.block_until_ready(dice_loss(preds_r, targs_r, smooth=1.0, square=True))
    ref_r = _dice_loss_ref(preds_r, targs_r, smooth=1.0, square=True)
    assert jnp.allclose(loss_r, ref_r, atol=1e-5, rtol=1e-5), (loss_r, ref_r)

    print("KERNEL_OK")
</pallas_src>

<mosaic_0001>
module attributes {stable_mosaic.version = 11 : i64} {
  func.func @_dice_partial_kernel(%arg0: i32, %arg1: i32, %arg2: memref<64x128xf32, #tpu.memory_space<vmem>>, %arg3: memref<64x128xf32, #tpu.memory_space<vmem>>, %arg4: memref<1x3xf32, #tpu.memory_space<smem>>, %arg5: memref<1x128xf32, #tpu.memory_space<vmem>>, %arg6: memref<1x128xf32, #tpu.memory_space<vmem>>, %arg7: memref<1x128xf32, #tpu.memory_space<vmem>>) attributes {dimension_semantics = [#tpu.dimension_semantics<parallel>, #tpu.dimension_semantics<arbitrary>], iteration_bounds = array<i64: 1, 1>, scalar_prefetch = 0 : i64, scratch_operands = 3 : i64, tpu.core_type = #tpu.core_type<tc>, window_params = [{transform_indices = @transform_0, window_bounds = array<i64: 64, 128>}, {transform_indices = @transform_1, window_bounds = array<i64: 64, 128>}, {transform_indices = @transform_2, window_bounds = array<i64: 1, 3>}]} {
    %c0_i32 = arith.constant 0 : i32
    %0 = arith.cmpi eq, %arg1, %c0_i32 : i32
    %1 = arith.extui %0 : i1 to i32
    %c0_i32_0 = arith.constant 0 : i32
    %2 = arith.cmpi ne, %1, %c0_i32_0 : i32
    scf.if %2 {
      %cst_20 = arith.constant 0.000000e+00 : f32
      %26 = vector.broadcast %cst_20 : f32 to vector<1x128xf32>
      %c0_21 = arith.constant 0 : index
      %c0_22 = arith.constant 0 : index
      %27 = vector.load %arg5[%c0_21, %c0_22] : memref<1x128xf32, #tpu.memory_space<vmem>>, vector<1x128xf32>
      tpu.vector_store %arg5[%c0_21, %c0_22], %26 {strides = array<i32>} : memref<1x128xf32, #tpu.memory_space<vmem>>, vector<1x128xf32>,
      %cst_23 = arith.constant 0.000000e+00 : f32
      %28 = vector.broadcast %cst_23 : f32 to vector<1x128xf32>
      %c0_24 = arith.constant 0 : index
      %c0_25 = arith.constant 0 : index
      %29 = vector.load %arg6[%c0_24, %c0_25] : memref<1x128xf32, #tpu.memory_space<vmem>>, vector<1x128xf32>
      tpu.vector_store %arg6[%c0_24, %c0_25], %28 {strides = array<i32>} : memref<1x128xf32, #tpu.memory_space<vmem>>, vector<1x128xf32>,
      %cst_26 = arith.constant 0.000000e+00 : f32
      %30 = vector.broadcast %cst_26 : f32 to vector<1x128xf32>
      %c0_27 = arith.constant 0 : index
      %c0_28 = arith.constant 0 : index
      %31 = vector.load %arg7[%c0_27, %c0_28] : memref<1x128xf32, #tpu.memory_space<vmem>>, vector<1x128xf32>
      tpu.vector_store %arg7[%c0_27, %c0_28], %30 {strides = array<i32>} : memref<1x128xf32, #tpu.memory_space<vmem>>, vector<1x128xf32>,
    } else {
    }
    %c0 = arith.constant 0 : index
    %c0_1 = arith.constant 0 : index
    %3 = vector.load %arg2[%c0, %c0_1] : memref<64x128xf32, #tpu.memory_space<vmem>>, vector<64x128xf32>
    %c0_2 = arith.constant 0 : index
    %c0_3 = arith.constant 0 : index
    %4 = vector.load %arg3[%c0_2, %c0_3] : memref<64x128xf32, #tpu.memory_space<vmem>>, vector<64x128xf32>
    %5 = arith.mulf %3, %4 : vector<64x128xf32>
    %6 = arith.mulf %3, %3 : vector<64x128xf32>
    %7 = arith.mulf %4, %4 : vector<64x128xf32>
    %c0_4 = arith.constant 0 : index
    %c0_5 = arith.constant 0 : index
    %8 = vector.load %arg5[%c0_4, %c0_5] : memref<1x128xf32, #tpu.memory_space<vmem>>, vector<1x128xf32>
    %cst = arith.constant dense<0.000000e+00> : vector<128xf32>
    %9 = vector.multi_reduction <add>, %5, %cst [0] : vector<64x128xf32> to vector<128xf32>
    %10 = vector.shape_cast %9 : vector<128xf32> to vector<1x128xf32>
    %11 = arith.addf %8, %10 : vector<1x128xf32>
    %c0_6 = arith.constant 0 : index
    %c0_7 = arith.constant 0 : index
    %12 = vector.load %arg5[%c0_6, %c0_7] : memref<1x128xf32, #tpu.memory_space<vmem>>, vector<1x128xf32>
    tpu.vector_store %arg5[%c0_6, %c0_7], %11 {strides = array<i32>} : memref<1x128xf32, #tpu.memory_space<vmem>>, vector<1x128xf32>,
    %c0_8 = arith.constant 0 : index
    %c0_9 = arith.constant 0 : index
    %13 = vector.load %arg6[%c0_8, %c0_9] : memref<1x128xf32, #tpu.memory_space<vmem>>, vector<1x128xf32>
    %cst_10 = arith.constant dense<0.000000e+00> : vector<128xf32>
    %14 = vector.multi_reduction <add>, %6, %cst_10 [0] : vector<64x128xf32> to vector<128xf32>
    %15 = vector.shape_cast %14 : vector<128xf32> to vector<1x128xf32>
    %16 = arith.addf %13, %15 : vector<1x128xf32>
    %c0_11 = arith.constant 0 : index
    %c0_12 = arith.constant 0 : index
    %17 = vector.load %arg6[%c0_11, %c0_12] : memref<1x128xf32, #tpu.memory_space<vmem>>, vector<1x128xf32>
    tpu.vector_store %arg6[%c0_11, %c0_12], %16 {strides = array<i32>} : memref<1x128xf32, #tpu.memory_space<vmem>>, vector<1x128xf32>,
    %c0_13 = arith.constant 0 : index
    %c0_14 = arith.constant 0 : index
    %18 = vector.load %arg7[%c0_13, %c0_14] : memref<1x128xf32, #tpu.memory_space<vmem>>, vector<1x128xf32>
    %cst_15 = arith.constant dense<0.000000e+00> : vector<128xf32>
    %19 = vector.multi_reduction <add>, %7, %cst_15 [0] : vector<64x128xf32> to vector<128xf32>
    %20 = vector.shape_cast %19 : vector<128xf32> to vector<1x128xf32>
    %21 = arith.addf %18, %20 : vector<1x128xf32>
    %c0_16 = arith.constant 0 : index
    %c0_17 = arith.constant 0 : index
    %22 = vector.load %arg7[%c0_16, %c0_17] : memref<1x128xf32, #tpu.memory_space<vmem>>, vector<1x128xf32>
    tpu.vector_store %arg7[%c0_16, %c0_17], %21 {strides = array<i32>} : memref<1x128xf32, #tpu.memory_space<vmem>>, vector<1x128xf32>,
    %c0_i32_18 = arith.constant 0 : i32
    %23 = arith.cmpi eq, %arg1, %c0_i32_18 : i32
    %24 = arith.extui %23 : i1 to i32
    %c0_i32_19 = arith.constant 0 : i32
    %25 = arith.cmpi ne, %24, %c0_i32_19 : i32
    scf.if %25 {
      %c0_20 = arith.constant 0 : index
      %c0_21 = arith.constant 0 : index
      %26 = vector.load %arg5[%c0_20, %c0_21] : memref<1x128xf32, #tpu.memory_space<vmem>>, vector<1x128xf32>
      %27 = vector.shape_cast %26 : vector<1x128xf32> to vector<1x1x128xf32>
      %cst_22 = arith.constant dense<0.000000e+00> : vector<1xf32>
      %28 = vector.multi_reduction <add>, %27, %cst_22 [1, 2] : vector<1x1x128xf32> to vector<1xf32>
      %29 = vector.shape_cast %28 : vector<1xf32> to vector<1x1x1xf32>
      %30 = vector.extract %29[0, 0, 0] : f32 from vector<1x1x1xf32>
      %c0_23 = arith.constant 0 : index
      %c0_24 = arith.constant 0 : index
      %31 = memref.load %arg4[%c0_23, %c0_24] : memref<1x3xf32, #tpu.memory_space<smem>>
      memref.store %30, %arg4[%c0_23, %c0_24] : memref<1x3xf32, #tpu.memory_space<smem>>
      %c0_25 = arith.constant 0 : index
      %c0_26 = arith.constant 0 : index
      %32 = vector.load %arg6[%c0_25, %c0_26] : memref<1x128xf32, #tpu.memory_space<vmem>>, vector<1x128xf32>
      %33 = vector.shape_cast %32 : vector<1x128xf32> to vector<1x1x128xf32>
      %cst_27 = arith.constant dense<0.000000e+00> : vector<1xf32>
      %34 = vector.multi_reduction <add>, %33, %cst_27 [1, 2] : vector<1x1x128xf32> to vector<1xf32>
      %35 = vector.shape_cast %34 : vector<1xf32> to vector<1x1x1xf32>
      %36 = vector.extract %35[0, 0, 0] : f32 from vector<1x1x1xf32>
      %c0_28 = arith.constant 0 : index
      %c1 = arith.constant 1 : index
      %37 = memref.load %arg4[%c0_28, %c1] : memref<1x3xf32, #tpu.memory_space<smem>>
      memref.store %36, %arg4[%c0_28, %c1] : memref<1x3xf32, #tpu.memory_space<smem>>
      %c0_29 = arith.constant 0 : index
      %c0_30 = arith.constant 0 : index
      %38 = vector.load %arg7[%c0_29, %c0_30] : memref<1x128xf32, #tpu.memory_space<vmem>>, vector<1x128xf32>
      %39 = vector.shape_cast %38 : vector<1x128xf32> to vector<1x1x128xf32>
      %cst_31 = arith.constant dense<0.000000e+00> : vector<1xf32>
      %40 = vector.multi_reduction <add>, %39, %cst_31 [1, 2] : vector<1x1x128xf32> to vector<1xf32>
      %41 = vector.shape_cast %40 : vector<1xf32> to vector<1x1x1xf32>
      %42 = vector.extract %41[0, 0, 0] : f32 from vector<1x1x1xf32>
      %c0_32 = arith.constant 0 : index
      %c2 = arith.constant 2 : index
      %43 = memref.load %arg4[%c0_32, %c2] : memref<1x3xf32, #tpu.memory_space<smem>>
      memref.store %42, %arg4[%c0_32, %c2] : memref<1x3xf32, #tpu.memory_space<smem>>
    } else {
    }
    return
  }
  func.func @transform_0(%arg0: i32, %arg1: i32) -> (i32, i32) {
    %c1_i32 = arith.constant 1 : i32
    %0 = arith.muli %arg0, %c1_i32 : i32
    %1 = arith.addi %0, %arg1 : i32
    %c0_i32 = arith.constant 0 : i32
    %2 = arith.minsi %1, %c0_i32 : i32
    %c0_i32_0 = arith.constant 0 : i32
    %c0_i32_1 = arith.constant 0 : i32
    return %2, %c0_i32_0 : i32, i32
  }
  func.func @transform_1(%arg0: i32, %arg1: i32) -> (i32, i32) {
    %c1_i32 = arith.constant 1 : i32
    %0 = arith.muli %arg0, %c1_i32 : i32
    %1 = arith.addi %0, %arg1 : i32
    %c0_i32 = arith.constant 0 : i32
    %2 = arith.minsi %1, %c0_i32 : i32
    %c0_i32_0 = arith.constant 0 : i32
    %c0_i32_1 = arith.constant 0 : i32
    return %2, %c0_i32_0 : i32, i32
  }
  func.func @transform_2(%arg0: i32, %arg1: i32) -> (i32, i32) {
    %c0_i32 = arith.constant 0 : i32
    %c0_i32_0 = arith.constant 0 : i32
    return %arg0, %c0_i32 : i32, i32
  }
}

</mosaic_0001>

<bundles_post_ra>
// kernel: tpu_custom_call.1
= control target key start
LH: loop header
LB: loop body
LE: loop exit
PB: predicated region body
PF: predicated region fallthrough
CT: control target
= control target key end

     0   :  { %7 = vsyncpa [#allocation6], 0  ;;  %s346_s0 = inlined_call_operand.hbm [shape: f32[64,128], index: 0, kind: input, shape index: {}]   ;;  %s347_s1 = inlined_call_operand.hbm [shape: f32[64,128], index: 1, kind: input, shape index: {}]   ;;  %s348_s2 = inlined_call_operand.hbm [shape: f32[1,3], index: 2, kind: output, shape index: {}]  }
   0x1   :  { %8 = vsyncpa [#allocation9], 0 }
   0x2   :  { %9 = vsyncpa [#allocation7], 0  ;;  %s289_s9 = smov [#allocation5]   ;;  %s229_s13 = scalar_lea.hbm %s346_s0, 1024 }
   0x3   :  { %s21_s10 = sshll.u32 %s289_s9, 4  ;;  %p230_p0 = scmp.ne.s32.totalorder %s346_s0, %s229_s13  ;;  %s22_s10 = int_to_ptr.vmem [resolvable:$true] %s21_s10 }
   0x4   :  { %p233_p1 = scmp.lt.u32.totalorder %s229_s13, %s346_s0 }
   0x6   :  { %p235_p2 = pnand %p233_p1, %p230_p0 }
   0x8   :  { %238 = shalt.err (!%p235_p2)
}
   0x9   :  { %s239_s18 = scalar_lea.vmem %s22_s10, 1024  ;;  %p244_p4 = scmp.lt.s32.totalorder %s22_s10, %s22_s10 }
   0xa   :  { %p240_p3 = scmp.ne.s32.totalorder %s22_s10, %s239_s18  ;;  %p245_p5 = scmp.lt.s32.totalorder %s239_s18, %s239_s18 }
   0xc   :  { %p246_p6 = por %p245_p5, %p244_p4 }
   0xe   :  { %p247_p7 = pnand %p246_p6, %p240_p3 }
  0x10   :  { %250 = shalt.err (!%p247_p7)
}
  0x11   :  { %s290_s19 = smov 128   ;;  %s291_s20 = smov 8  }
  0x12   :  { %27 = dma.hbm_to_vmem [thread:$0]  %s346_s0, 1024, %s22_s10, [#allocation6], %s290_s19, %s290_s19, %s291_s20  }
  0x13   :  { %s292_s23 = smov [#allocation8]   ;;  %s251_s27 = scalar_lea.hbm %s347_s1, 1024 }
  0x14   :  { %s39_s24 = sshll.u32 %s292_s23, 4  ;;  %p252_p8 = scmp.ne.s32.totalorder %s347_s1, %s251_s27  ;;  %s40_s24 = int_to_ptr.vmem [resolvable:$true] %s39_s24 }
  0x15   :  { %p255_p9 = scmp.lt.u32.totalorder %s251_s27, %s347_s1 }
  0x17   :  { %p257_p10 = pnand %p255_p9, %p252_p8 }
  0x19   :  { %260 = shalt.err (!%p257_p10)
}
  0x1a   :  { %s261_s4 = scalar_lea.vmem %s40_s24, 1024  ;;  %p266_p12 = scmp.lt.s32.totalorder %s40_s24, %s40_s24 }
  0x1b   :  { %p262_p11 = scmp.ne.s32.totalorder %s40_s24, %s261_s4  ;;  %p267_p13 = scmp.lt.s32.totalorder %s261_s4, %s261_s4 }
  0x1d   :  { %p268_p0 = por %p267_p13, %p266_p12 }
  0x1f   :  { %p269_p1 = pnand %p268_p0, %p262_p11 }
  0x21   :  { %272 = shalt.err (!%p269_p1)
}
  0x22   :  { %45 = dma.hbm_to_vmem [thread:$0]  %s347_s1, 1024, %s40_s24, [#allocation9], %s290_s19, %s290_s19, %s291_s20  }
  0x23   :  { %283 = dma.done.wait [#allocation6], 1024  }
  0x24   :  { %284 = vsyncadd [#allocation6], 4294966272 }
  0x25   :  { %285 = dma.done.wait [#allocation9], 1024  }
  0x26   :  { %286 = vsyncadd [#allocation9], 4294966272  ;;  %v293_v0 = vmov 0.0   ;;  %v75_v1 = vld [vmem:[#allocation8] sm:$0xff]  ;;  %v76_v2 = vld [vmem:[#allocation8 + $0x8] sm:$0xff]  ;;  %vm159_vm0 = vcmask 1040384  }
  0x27   :  { %66 = vst [vmem:[#allocation4] sm:$0x1] %v293_v0  ;;  %64 = vst [vmem:[#allocation2] sm:$0x1] %v293_v0  ;;  %v77_v3 = vld [vmem:[#allocation8 + $0x10] sm:$0xff]  ;;  %v78_v4 = vld [vmem:[#allocation8 + $0x18] sm:$0xff]  ;;  %v99_v5 = vmul.f32 %v75_v1, %v75_v1  ;;  %v100_v6 = vmul.f32 %v76_v2, %v76_v2 }
  0x28   :  { %65 = vst [vmem:[#allocation3] sm:$0x1] %v293_v0  ;;  %v101_v7 = vmul.f32 %v77_v3, %v77_v3  ;;  %v79_v8 = vld [vmem:[#allocation8 + $0x20] sm:$0xff]  ;;  %v102_v9 = vmul.f32 %v78_v4, %v78_v4  ;;  %v68_v12 = vld [vmem:[#allocation5 + $0x8] sm:$0xff]  ;;  %v69_v13 = vld [vmem:[#allocation5 + $0x10] sm:$0xff]  ;;  %s273_s10 = scalar_lea.hbm %s348_s2, 16 }
  0x29   :  { %v140_v10 = vadd.f32 %v100_v6, %v99_v5  ;;  %v67_v11 = vld [vmem:[#allocation5] sm:$0xff]  ;;  %v80_v14 = vld [vmem:[#allocation8 + $0x28] sm:$0xff]  ;;  %v70_v15 = vld [vmem:[#allocation5 + $0x18] sm:$0xff]  ;;  %v84_v17 = vmul.f32 %v76_v2, %v68_v12  ;;  %v85_v18 = vmul.f32 %v77_v3, %v69_v13  ;;  %v103_v19 = vmul.f32 %v79_v8, %v79_v8  ;;  %p274_p2 = scmp.ne.s32.totalorder %s348_s2, %s273_s10  ;;  %p277_p3 = scmp.lt.u32.totalorder %s273_s10, %s348_s2 }
  0x2a   :  { %v83_v16 = vmul.f32 %v75_v1, %v67_v11  ;;  %v71_v21 = vld [vmem:[#allocation5 + $0x20] sm:$0xff]  ;;  %v91_v22 = vmul.f32 %v67_v11, %v67_v11  ;;  %v81_v23 = vld [vmem:[#allocation8 + $0x30] sm:$0xff]  ;;  %v86_v24 = vmul.f32 %v78_v4, %v70_v15  ;;  %v92_v26 = vmul.f32 %v68_v12, %v68_v12  ;;  %v72_v29 = vld [vmem:[#allocation5 + $0x28] sm:$0xff] }
  0x2b   :  { %v141_v20 = vadd.f32 %v140_v10, %v101_v7  ;;  %v104_v27 = vmul.f32 %v80_v14, %v80_v14  ;;  %v93_v30 = vmul.f32 %v69_v13, %v69_v13  ;;  %v82_v31 = vld [vmem:[#allocation8 + $0x38] sm:$0xff]  ;;  %v87_v32 = vmul.f32 %v79_v8, %v71_v21  ;;  %v73_v36 = vld [vmem:[#allocation5 + $0x30] sm:$0xff]  ;;  %p279_p4 = pnand %p277_p3, %p274_p2 }
  0x2c   :  { %v108_v25 = vadd.f32 %v84_v17, %v83_v16  ;;  %v105_v34 = vmul.f32 %v81_v23, %v81_v23  ;;  %v94_v37 = vmul.f32 %v70_v15, %v70_v15  ;;  %v124_v38 = vadd.f32 %v92_v26, %v91_v22  ;;  %v74_v43 = vld [vmem:[#allocation5 + $0x38] sm:$0xff] }
  0x2d   :  { %v142_v28 = vadd.f32 %v141_v20, %v102_v9  ;;  %v88_v39 = vmul.f32 %v80_v14, %v72_v29  ;;  %v106_v41 = vmul.f32 %v82_v31, %v82_v31  ;;  %v95_v44 = vmul.f32 %v71_v21, %v71_v21 }
  0x2e   :  { %v109_v33 = vadd.f32 %v108_v25, %v85_v18  ;;  %v125_v45 = vadd.f32 %v124_v38, %v93_v30  ;;  %v89_v46 = vmul.f32 %v81_v23, %v73_v36  ;;  %v96_v49 = vmul.f32 %v72_v29, %v72_v29  ;;  %v139_v8 = vld [vmem:[#allocation4] sm:$0x1]  ;;  %v107_v14 = vld [vmem:[#allocation2] sm:$0x1] }
  0x2f   :  { %v143_v35 = vadd.f32 %v142_v28, %v103_v19  ;;  %v90_v51 = vmul.f32 %v82_v31, %v74_v43  ;;  %v97_v54 = vmul.f32 %v73_v36, %v73_v36  ;;  %v98_v58 = vmul.f32 %v74_v43, %v74_v43  ;;  %v123_v19 = vld [vmem:[#allocation3] sm:$0x1] }
  0x30   :  { %v110_v40 = vadd.f32 %v109_v33, %v86_v24  ;;  %v126_v50 = vadd.f32 %v125_v45, %v94_v37 }
  0x31   :  { %v144_v42 = vadd.f32 %v143_v35, %v104_v27 }
  0x32   :  { %v111_v47 = vadd.f32 %v110_v40, %v87_v32  ;;  %v127_v55 = vadd.f32 %v126_v50, %v95_v44 }
  0x33   :  { %v145_v48 = vadd.f32 %v144_v42, %v105_v34 }
  0x34   :  { %v112_v52 = vadd.f32 %v111_v47, %v88_v39  ;;  %v128_v59 = vadd.f32 %v127_v55, %v96_v49 }
  0x35   :  { %v146_v53 = vadd.f32 %v145_v48, %v106_v41 }
  0x36   :  { %v113_v56 = vadd.f32 %v112_v52, %v89_v46  ;;  %v129_v62 = vadd.f32 %v128_v59, %v97_v54 }
  0x37   :  { %v147_v57 = vrot.slane %v146_v53, 4 }
  0x38   :  { %v114_v60 = vadd.f32 %v113_v56, %v90_v51  ;;  %v130_v1 = vadd.f32 %v129_v62, %v98_v58 }
  0x39   :  { %v148_v61 = vadd.f32 %v147_v57, %v146_v53 }
  0x3a   :  { %v115_v63 = vrot.slane %v114_v60, 4  ;;  %v131_v4 = vrot.slane %v130_v1, 4 }
  0x3b   :  { %v149_v0 = vrot.slane %v148_v61, 2 }
  0x3c   :  { %v116_v2 = vadd.f32 %v115_v63, %v114_v60  ;;  %v132_v7 = vadd.f32 %v131_v4, %v130_v1 }
  0x3d   :  { %v150_v3 = vadd.f32 %v149_v0, %v148_v61 }
  0x3e   :  { %v117_v5 = vrot.slane %v116_v2, 2  ;;  %v133_v11 = vrot.slane %v132_v7, 2 }
  0x3f   :  { %v151_v6 = vrot.slane %v150_v3, 1 }
  0x40   :  { %v118_v9 = vadd.f32 %v117_v5, %v116_v2  ;;  %v134_v15 = vadd.f32 %v133_v11, %v132_v7 }
  0x41   :  { %v152_v10 = vadd.f32 %v151_v6, %v150_v3 }
  0x42   :  { %v119_v12 = vrot.slane %v118_v9, 1  ;;  %v135_v17 = vrot.slane %v134_v15, 1 }
  0x43   :  { %v153_v13 = vadd.f32 %v152_v10, %v139_v8 }
  0x44   :  { %v120_v16 = vadd.f32 %v119_v12, %v118_v9  ;;  %v136_v20 = vadd.f32 %v135_v17, %v134_v15 }
  0x45   :  { %154 = vst [vmem:[#allocation4] sm:$0x1] %v153_v13 }
  0x46   :  { %v121_v18 = vadd.f32 %v120_v16, %v107_v14  ;;  %v137_v21 = vadd.f32 %v136_v20, %v123_v19 }
  0x48   :  { %122 = vst [vmem:[#allocation2] sm:$0x1] %v121_v18  ;;  %138 = vst [vmem:[#allocation3] sm:$0x1] %v137_v21 }
  0x4c   :  { %v185_v22 = vld [vmem:[#allocation4] sm:$0x1] }
  0x4d   :  { %v186_v23 = vsel %vm159_vm0, %v185_v22, 0.0 }
  0x4e   :  { %187 = vadd.xlane.f32.xlu1 %v186_v23 }
  0x4f   :  { %v158_v24 = vld [vmem:[#allocation2] sm:$0x1]  ;;  %v172_v26 = vld [vmem:[#allocation3] sm:$0x1] }
  0x50   :  { %v160_v25 = vsel %vm159_vm0, %v158_v24, 0.0  ;;  %v173_v27 = vsel %vm159_vm0, %v172_v26, 0.0 }
  0x51   :  { %161 = vadd.xlane.f32.xlu0 %v160_v25 }
  0x55   :  { %174 = vadd.xlane.f32.xlu0 %v173_v27 }
  0xdb   :  { %v188_v28 = vpop.xlane.xlu1 %187 }
  0xdc   :  { %v189_v29 = vrot.slane %v188_v28, 4 }
  0xde   :  { %v190_v30 = vadd.f32 %v189_v29, %v188_v28  ;;  %v162_v31 = vpop.xlane.xlu0 %161 }
  0xdf   :  { %v163_v32 = vrot.slane %v162_v31, 4 }
  0xe0   :  { %v191_v34 = vrot.slane %v190_v30, 2 }
  0xe1   :  { %v164_v33 = vadd.f32 %v163_v32, %v162_v31 }
  0xe2   :  { %v175_v35 = vpop.xlane.xlu0 %174  ;;  %v192_v40 = vadd.f32 %v191_v34, %v190_v30 }
  0xe3   :  { %v165_v36 = vrot.slane %v164_v33, 2  ;;  %v176_v37 = vrot.slane %v175_v35, 4 }
  0xe4   :  { %v193_v45 = vrot.slane %v192_v40, 1 }
  0xe5   :  { %v177_v38 = vadd.f32 %v176_v37, %v175_v35  ;;  %v166_v39 = vadd.f32 %v165_v36, %v164_v33 }
  0xe6   :  { %v194_v48 = vadd.f32 %v193_v45, %v192_v40 }
  0xe7   :  { %v178_v41 = vrot.slane %v177_v38, 2  ;;  %v167_v42 = vrot.slane %v166_v39, 1 }
  0xe9   :  { %v179_v43 = vadd.f32 %v178_v41, %v177_v38  ;;  %v168_v44 = vadd.f32 %v167_v42, %v166_v39 }
  0xeb   :  { %217 = vpush %v168_v44  ;;  %v180_v46 = vrot.slane %v179_v43, 1 }
  0xed   :  { %v181_v47 = vadd.f32 %v180_v46, %v179_v43 }
  0xef   :  { %219 = vpush %v181_v47 }
  0xf0   :  { %221 = vpush %v194_v48 }
 0x11c   :  { %s218_s1 = spop %217 }
 0x11d   :  { %171 = sst [smem:[#allocation10]] %s218_s1 }
 0x120   :  { %s220_s6 = spop %219 }
 0x121   :  { %184 = sst [smem:[#allocation10 + $0x1]] %s220_s6  ;;  %s222_s7 = spop %221 }
 0x122   :  { %197 = sst [smem:[#allocation10 + $0x2]] %s222_s7 }
 0x123   :  { %282 = shalt.err (!%p279_p4)
}
 0x124   :  { %s294_s15 = smov [#allocation10]  }
 0x125   :  { %205 = dma.smem_to_hbm %s294_s15, 16, %s348_s2, [#allocation7]  }
 0x126   :  { %287 = dma.done.wait [#allocation7], 16  }
 0x127   :  { %288 = vsyncadd [#allocation7], 4294967280 }
 0x128   :  { %209 = sfence }
 0x129   :  { %210 = vsyncpa [#allocation6], 1 }
 0x12a   :  { %211 = vsyncpa [#allocation9], 1 }
 0x12b   :  { %212 = vsyncpa [#allocation7], 1 }

</bundles_post_ra>
